<compile_context>
chip_gen: v5e
topology: v5e:2x2
jax: 0.10.0
libtpu: 0.0.40
codegen_flags: <defaults>
</compile_context>

<pallas_src>
import functools

import jax
import jax.numpy as jnp
from jax import lax
from jax.experimental import pallas as pl
from jax.experimental.pallas import tpu as pltpu


def _spcn_conv_prelu_kernel(x_ref, w_ref, b_ref, mask_ref, alpha_ref, o_ref,
                            im2col_ref, *, H, W, Cin, K, pad):
    """KxK 'same' conv (zero pad) + bias + PReLU on one (Cin, H*W) block.

    x_ref      : (1, Cin, H*W)    f32   input, spatial flattened on the lane axis
    w_ref      : (Cout, K*K*Cin)  bf16  flattened conv weight (tap-major, ci-minor)
    b_ref      : (Cout, 1)        f32   conv bias
    mask_ref   : (K*K, H*W)       f32   per-tap validity masks (zero padding)
    alpha_ref  : (1, 1)           f32   PReLU scalar weight (SMEM)
    o_ref      : (1, Cout, H*W)   f32   conv + PReLU output (pre pixel shuffle)
    im2col_ref : (K*K*Cin, H*W)   f32   VMEM scratch holding the im2col matrix
    """
    S = H * W
    x = x_ref[0]                                       # (Cin, S) f32, held in vregs

    # Build the im2col matrix: one XLU roll per tap + zero-padding mask (no
    # slice+reshape relayouts, no padded input in HBM).
    for kh in range(K):
        for kw in range(K):
            t = kh * K + kw
            off = (kh - pad) * W + (kw - pad)          # flat spatial shift of this tap
            if off == 0:
                piece = x                              # center tap: no shift, no mask
            else:
                shifted = pltpu.roll(x, shift=(-off) % S, axis=1)
                piece = shifted * mask_ref[pl.ds(t, 1), :]   # zero the halo positions
            im2col_ref[pl.ds(t * Cin, Cin), :] = piece

    # Single lane-dense MXU matmul: (Cout, K*K*Cin) @ (K*K*Cin, S) -> (Cout, S), f32 acc.
    acc = jnp.dot(w_ref[...], im2col_ref[...].astype(w_ref.dtype),
                  preferred_element_type=jnp.float32)
    acc = acc + b_ref[...]                             # bias, broadcast over lanes
    alpha = alpha_ref[0, 0]                            # PReLU scalar from SMEM
    acc = jnp.where(acc > 0, acc, alpha * acc)         # PReLU (scalar parameter)
    o_ref[0] = acc.astype(o_ref.dtype)


def spcn_block(x_nchw, conv_w, conv_b, prelu_w, upscale_factor=2, kernel_size=3,
               matmul_dtype=jnp.bfloat16):
    """Forward of SPCNBlock: conv(k, pad=k//2) -> PixelShuffle(r) -> PReLU (scalar).

    x_nchw : (N, Cin, H, W) f32, conv_w : (Cin*r^2, Cin, K, K) OIHW, conv_b : (Cin*r^2,)
    Returns (N, Cin, H*r, W*r) NCHW, matching the PyTorch module.
    """
    N, Cin, H, W = x_nchw.shape
    Cout = conv_w.shape[0]
    K = kernel_size
    assert K % 2 == 1, "kernel_size must be odd (PyTorch padding=k//2 'same' conv)"
    pad = K // 2
    r = upscale_factor
    S = H * W
    KKC = K * K * Cin

    # Free reshape: consume the NCHW input directly (no NHWC transpose, no HBM pad).
    x_flat = x_nchw.reshape(N, Cin, S)

    # OIHW -> (Cout, K*K*Cin), tap-major / input-channel-minor; bf16 MXU operand.
    w_flat = jnp.transpose(conv_w, (0, 2, 3, 1)).reshape(Cout, KKC).astype(matmul_dtype)
    b2 = conv_b.reshape(Cout, 1).astype(jnp.float32)
    alpha = jnp.reshape(prelu_w, (1, 1)).astype(jnp.float32)

    # Per-tap validity masks implementing the conv's zero padding on the flattened
    # spatial axis (tiny constant block, same index every grid step -> DMA'd once).
    hh = jnp.repeat(jnp.arange(H, dtype=jnp.int32), W)
    ww = jnp.tile(jnp.arange(W, dtype=jnp.int32), H)
    rows = []
    for kh in range(K):
        for kw in range(K):
            dh, dw = kh - pad, kw - pad
            rows.append((hh + dh >= 0) & (hh + dh < H) & (ww + dw >= 0) & (ww + dw < W))
    masks = jnp.stack(rows, axis=0).astype(jnp.float32)          # (K*K, S)

    kernel = functools.partial(_spcn_conv_prelu_kernel,
                               H=H, W=W, Cin=Cin, K=K, pad=pad)

    conv_out = pl.pallas_call(
        kernel,
        out_shape=jax.ShapeDtypeStruct((N, Cout, S), jnp.float32),
        grid_spec=pltpu.PrefetchScalarGridSpec(
            num_scalar_prefetch=0,
            grid=(N,),
            in_specs=[
                pl.BlockSpec((1, Cin, S), lambda n: (n, 0, 0)),        # input block
                pl.BlockSpec((Cout, KKC), lambda n: (0, 0)),           # flat weight
                pl.BlockSpec((Cout, 1), lambda n: (0, 0)),             # bias
                pl.BlockSpec((K * K, S), lambda n: (0, 0)),            # pad masks
                pl.BlockSpec(memory_space=pltpu.MemorySpace.SMEM),     # PReLU scalar
            ],
            out_specs=pl.BlockSpec((1, Cout, S), lambda n: (n, 0, 0)),
            scratch_shapes=[pltpu.VMEM((KKC, S), jnp.float32)],        # im2col scratch
        ),
        compiler_params=pltpu.CompilerParams(dimension_semantics=("parallel",)),
    )(x_flat, w_flat, b2, masks, alpha)

    # PixelShuffle: pure permutation. conv_out is already channel-major (NCHW conv
    # layout with flattened spatial), so only the r x r interleave remains here.
    C = Cout // (r * r)
    y = conv_out.reshape(N, C, r, r, H, W)
    y = jnp.transpose(y, (0, 1, 4, 2, 5, 3)).reshape(N, C, H * r, W * r)
    return y


def _reference(x_nchw, conv_w, conv_b, prelu_w, upscale_factor=2, kernel_size=3):
    pad = kernel_size // 2
    r = upscale_factor
    out = lax.conv_general_dilated(
        x_nchw, conv_w, window_strides=(1, 1),
        padding=((pad, pad), (pad, pad)),
        dimension_numbers=("NCHW", "OIHW", "NCHW"),
    ) + conv_b.reshape(1, -1, 1, 1)
    N, Cout, H, W = out.shape
    C = Cout // (r * r)
    out = out.reshape(N, C, r, r, H, W)
    out = jnp.transpose(out, (0, 1, 4, 2, 5, 3)).reshape(N, C, H * r, W * r)
    return jnp.where(out > 0, out, prelu_w * out)


if __name__ == "__main__":
    key = jax.random.PRNGKey(0)
    N, Cin, H, W = 2, 4, 16, 16
    upscale, K = 2, 3
    Cout = Cin * upscale ** 2

    k1, k2, k3 = jax.random.split(key, 3)
    x = jax.random.normal(k1, (N, Cin, H, W), dtype=jnp.float32)
    # Deterministic "init" for the conv params (kaiming-ish scale), PReLU=0.25.
    fan_in = Cin * K * K
    conv_w = jax.random.normal(k2, (Cout, Cin, K, K), dtype=jnp.float32) / jnp.sqrt(fan_in)
    conv_b = jax.random.normal(k3, (Cout,), dtype=jnp.float32) * 0.01
    prelu_w = jnp.float32(0.25)

    fwd = jax.jit(functools.partial(spcn_block, upscale_factor=upscale, kernel_size=K))
    out = jax.block_until_ready(fwd(x, conv_w, conv_b, prelu_w))

    ref = _reference(x, conv_w, conv_b, prelu_w, upscale, K)
    assert out.shape == (N, Cin, H * upscale, W * upscale), out.shape
    max_err = float(jnp.max(jnp.abs(out - ref)))
    # bf16 MXU operands with f32 accumulation -> expect O(1e-3..1e-2) abs deviation
    # from the pure-f32 reference at these magnitudes.
    assert max_err < 3e-2, max_err
    print("KERNEL_OK")
</pallas_src>

<mosaic_0001>
module attributes {stable_mosaic.version = 11 : i64} {
  func.func @_spcn_conv_prelu_kernel(%arg0: i32, %arg1: memref<1x4x256xf32, #tpu.memory_space<vmem>>, %arg2: memref<16x36xbf16, #tpu.memory_space<vmem>>, %arg3: memref<16x1xf32, #tpu.memory_space<vmem>>, %arg4: memref<9x256xf32, #tpu.memory_space<vmem>>, %arg5: memref<1x1xf32, #tpu.memory_space<smem>>, %arg6: memref<1x16x256xf32, #tpu.memory_space<vmem>>, %arg7: memref<36x256xf32, #tpu.memory_space<vmem>>) attributes {dimension_semantics = [#tpu.dimension_semantics<parallel>], iteration_bounds = array<i64: 2>, scalar_prefetch = 0 : i64, scratch_operands = 1 : i64, tpu.core_type = #tpu.core_type<tc>, window_params = [{transform_indices = @transform_0, window_bounds = array<i64: 1, 4, 256>}, {pipeline_mode = #tpu.pipeline_mode<synchronous>, transform_indices = @transform_1, window_bounds = array<i64: 16, 36>}, {pipeline_mode = #tpu.pipeline_mode<synchronous>, transform_indices = @transform_2, window_bounds = array<i64: 16, 1>}, {pipeline_mode = #tpu.pipeline_mode<synchronous>, transform_indices = @transform_3, window_bounds = array<i64: 9, 256>}, {transform_indices = @transform_4, window_bounds = array<i64: 1, 1>}, {transform_indices = @transform_5, window_bounds = array<i64: 1, 16, 256>}]} {
    %c0 = arith.constant 0 : index
    %c0_0 = arith.constant 0 : index
    %c0_1 = arith.constant 0 : index
    %0 = vector.load %arg1[%c0, %c0_0, %c0_1] : memref<1x4x256xf32, #tpu.memory_space<vmem>>, vector<1x4x256xf32>
    %1 = vector.shape_cast %0 : vector<1x4x256xf32> to vector<4x256xf32>
    %c17_i32 = arith.constant 17 : i32
    %2 = tpu.dynamic_rotate %1 by %c17_i32 dim 1 : vector<4x256xf32>, i32 -> vector<4x256xf32>
    %c0_2 = arith.constant 0 : index
    %c0_3 = arith.constant 0 : index
    %3 = vector.load %arg4[%c0_2, %c0_3] : memref<9x256xf32, #tpu.memory_space<vmem>>, vector<1x256xf32>
    %4 = vector.broadcast %3 : vector<1x256xf32> to vector<4x256xf32>
    %5 = arith.mulf %2, %4 : vector<4x256xf32>
    %c0_4 = arith.constant 0 : index
    %c0_5 = arith.constant 0 : index
    %6 = vector.load %arg7[%c0_4, %c0_5] : memref<36x256xf32, #tpu.memory_space<vmem>>, vector<4x256xf32>
    tpu.vector_store %arg7[%c0_4, %c0_5], %5 {strides = array<i32>} : memref<36x256xf32, #tpu.memory_space<vmem>>, vector<4x256xf32>,
    %c16_i32 = arith.constant 16 : i32
    %7 = tpu.dynamic_rotate %1 by %c16_i32 dim 1 : vector<4x256xf32>, i32 -> vector<4x256xf32>
    %c1 = arith.constant 1 : index
    %c0_6 = arith.constant 0 : index
    %8 = vector.load %arg4[%c1, %c0_6] : memref<9x256xf32, #tpu.memory_space<vmem>>, vector<1x256xf32>
    %9 = vector.broadcast %8 : vector<1x256xf32> to vector<4x256xf32>
    %10 = arith.mulf %7, %9 : vector<4x256xf32>
    %c4 = arith.constant 4 : index
    %c0_7 = arith.constant 0 : index
    %11 = vector.load %arg7[%c4, %c0_7] : memref<36x256xf32, #tpu.memory_space<vmem>>, vector<4x256xf32>
    tpu.vector_store %arg7[%c4, %c0_7], %10 {strides = array<i32>} : memref<36x256xf32, #tpu.memory_space<vmem>>, vector<4x256xf32>,
    %c15_i32 = arith.constant 15 : i32
    %12 = tpu.dynamic_rotate %1 by %c15_i32 dim 1 : vector<4x256xf32>, i32 -> vector<4x256xf32>
    %c2 = arith.constant 2 : index
    %c0_8 = arith.constant 0 : index
    %13 = vector.load %arg4[%c2, %c0_8] : memref<9x256xf32, #tpu.memory_space<vmem>>, vector<1x256xf32>
    %14 = vector.broadcast %13 : vector<1x256xf32> to vector<4x256xf32>
    %15 = arith.mulf %12, %14 : vector<4x256xf32>
    %c8 = arith.constant 8 : index
    %c0_9 = arith.constant 0 : index
    %16 = vector.load %arg7[%c8, %c0_9] : memref<36x256xf32, #tpu.memory_space<vmem>>, vector<4x256xf32>
    tpu.vector_store %arg7[%c8, %c0_9], %15 {strides = array<i32>} : memref<36x256xf32, #tpu.memory_space<vmem>>, vector<4x256xf32>,
    %c1_i32 = arith.constant 1 : i32
    %17 = tpu.dynamic_rotate %1 by %c1_i32 dim 1 : vector<4x256xf32>, i32 -> vector<4x256xf32>
    %c3 = arith.constant 3 : index
    %c0_10 = arith.constant 0 : index
    %18 = vector.load %arg4[%c3, %c0_10] : memref<9x256xf32, #tpu.memory_space<vmem>>, vector<1x256xf32>
    %19 = vector.broadcast %18 : vector<1x256xf32> to vector<4x256xf32>
    %20 = arith.mulf %17, %19 : vector<4x256xf32>
    %c12 = arith.constant 12 : index
    %c0_11 = arith.constant 0 : index
    %21 = vector.load %arg7[%c12, %c0_11] : memref<36x256xf32, #tpu.memory_space<vmem>>, vector<4x256xf32>
    tpu.vector_store %arg7[%c12, %c0_11], %20 {strides = array<i32>} : memref<36x256xf32, #tpu.memory_space<vmem>>, vector<4x256xf32>,
    %c16 = arith.constant 16 : index
    %c0_12 = arith.constant 0 : index
    %22 = vector.load %arg7[%c16, %c0_12] : memref<36x256xf32, #tpu.memory_space<vmem>>, vector<4x256xf32>
    tpu.vector_store %arg7[%c16, %c0_12], %1 {strides = array<i32>} : memref<36x256xf32, #tpu.memory_space<vmem>>, vector<4x256xf32>,
    %c255_i32 = arith.constant 255 : i32
    %23 = tpu.dynamic_rotate %1 by %c255_i32 dim 1 : vector<4x256xf32>, i32 -> vector<4x256xf32>
    %c5 = arith.constant 5 : index
    %c0_13 = arith.constant 0 : index
    %24 = vector.load %arg4[%c5, %c0_13] : memref<9x256xf32, #tpu.memory_space<vmem>>, vector<1x256xf32>
    %25 = vector.broadcast %24 : vector<1x256xf32> to vector<4x256xf32>
    %26 = arith.mulf %23, %25 : vector<4x256xf32>
    %c20 = arith.constant 20 : index
    %c0_14 = arith.constant 0 : index
    %27 = vector.load %arg7[%c20, %c0_14] : memref<36x256xf32, #tpu.memory_space<vmem>>, vector<4x256xf32>
    tpu.vector_store %arg7[%c20, %c0_14], %26 {strides = array<i32>} : memref<36x256xf32, #tpu.memory_space<vmem>>, vector<4x256xf32>,
    %c241_i32 = arith.constant 241 : i32
    %28 = tpu.dynamic_rotate %1 by %c241_i32 dim 1 : vector<4x256xf32>, i32 -> vector<4x256xf32>
    %c6 = arith.constant 6 : index
    %c0_15 = arith.constant 0 : index
    %29 = vector.load %arg4[%c6, %c0_15] : memref<9x256xf32, #tpu.memory_space<vmem>>, vector<1x256xf32>
    %30 = vector.broadcast %29 : vector<1x256xf32> to vector<4x256xf32>
    %31 = arith.mulf %28, %30 : vector<4x256xf32>
    %c24 = arith.constant 24 : index
    %c0_16 = arith.constant 0 : index
    %32 = vector.load %arg7[%c24, %c0_16] : memref<36x256xf32, #tpu.memory_space<vmem>>, vector<4x256xf32>
    tpu.vector_store %arg7[%c24, %c0_16], %31 {strides = array<i32>} : memref<36x256xf32, #tpu.memory_space<vmem>>, vector<4x256xf32>,
    %c240_i32 = arith.constant 240 : i32
    %33 = tpu.dynamic_rotate %1 by %c240_i32 dim 1 : vector<4x256xf32>, i32 -> vector<4x256xf32>
    %c7 = arith.constant 7 : index
    %c0_17 = arith.constant 0 : index
    %34 = vector.load %arg4[%c7, %c0_17] : memref<9x256xf32, #tpu.memory_space<vmem>>, vector<1x256xf32>
    %35 = vector.broadcast %34 : vector<1x256xf32> to vector<4x256xf32>
    %36 = arith.mulf %33, %35 : vector<4x256xf32>
    %c28 = arith.constant 28 : index
    %c0_18 = arith.constant 0 : index
    %37 = vector.load %arg7[%c28, %c0_18] : memref<36x256xf32, #tpu.memory_space<vmem>>, vector<4x256xf32>
    tpu.vector_store %arg7[%c28, %c0_18], %36 {strides = array<i32>} : memref<36x256xf32, #tpu.memory_space<vmem>>, vector<4x256xf32>,
    %c239_i32 = arith.constant 239 : i32
    %38 = tpu.dynamic_rotate %1 by %c239_i32 dim 1 : vector<4x256xf32>, i32 -> vector<4x256xf32>
    %c8_19 = arith.constant 8 : index
    %c0_20 = arith.constant 0 : index
    %39 = vector.load %arg4[%c8_19, %c0_20] : memref<9x256xf32, #tpu.memory_space<vmem>>, vector<1x256xf32>
    %40 = vector.broadcast %39 : vector<1x256xf32> to vector<4x256xf32>
    %41 = arith.mulf %38, %40 : vector<4x256xf32>
    %c32 = arith.constant 32 : index
    %c0_21 = arith.constant 0 : index
    %42 = vector.load %arg7[%c32, %c0_21] : memref<36x256xf32, #tpu.memory_space<vmem>>, vector<4x256xf32>
    tpu.vector_store %arg7[%c32, %c0_21], %41 {strides = array<i32>} : memref<36x256xf32, #tpu.memory_space<vmem>>, vector<4x256xf32>,
    %c0_22 = arith.constant 0 : index
    %c0_23 = arith.constant 0 : index
    %43 = vector.load %arg2[%c0_22, %c0_23] : memref<16x36xbf16, #tpu.memory_space<vmem>>, vector<16x36xbf16>
    %c0_24 = arith.constant 0 : index
    %c0_25 = arith.constant 0 : index
    %44 = vector.load %arg7[%c0_24, %c0_25] : memref<36x256xf32, #tpu.memory_space<vmem>>, vector<36x256xf32>
    %45 = arith.truncf %44 : vector<36x256xf32> to vector<36x256xbf16>
    %cst = arith.constant dense<0.000000e+00> : vector<16x256xf32>
    %46 = tpu.matmul %43, %45, %cst {dimension_numbers = #tpu.dot_dimension_numbers<[1], [0], [0], [1], [0, 0, 1, 1], [], []>} : vector<16x36xbf16>, vector<36x256xbf16>, vector<16x256xf32> -> vector<16x256xf32>
    %c0_26 = arith.constant 0 : index
    %c0_27 = arith.constant 0 : index
    %47 = vector.load %arg3[%c0_26, %c0_27] : memref<16x1xf32, #tpu.memory_space<vmem>>, vector<16x1xf32>
    %48 = vector.broadcast %47 : vector<16x1xf32> to vector<16x256xf32>
    %49 = arith.addf %46, %48 : vector<16x256xf32>
    %c0_28 = arith.constant 0 : index
    %c0_29 = arith.constant 0 : index
    %50 = memref.load %arg5[%c0_28, %c0_29] : memref<1x1xf32, #tpu.memory_space<smem>>
    %cst_30 = arith.constant 0.000000e+00 : f32
    %51 = vector.broadcast %cst_30 : f32 to vector<16x256xf32>
    %52 = arith.cmpf ogt, %49, %51 : vector<16x256xf32>
    %53 = vector.broadcast %50 : f32 to vector<16x256xf32>
    %54 = arith.mulf %53, %49 : vector<16x256xf32>
    %55 = arith.select %52, %49, %54 : vector<16x256xi1>, vector<16x256xf32>
    %c0_31 = arith.constant 0 : index
    %c0_32 = arith.constant 0 : index
    %c0_33 = arith.constant 0 : index
    %56 = vector.load %arg6[%c0_31, %c0_32, %c0_33] : memref<1x16x256xf32, #tpu.memory_space<vmem>>, vector<1x16x256xf32>
    %57 = vector.shape_cast %56 : vector<1x16x256xf32> to vector<16x256xf32>
    %58 = vector.shape_cast %55 : vector<16x256xf32> to vector<1x16x256xf32>
    tpu.vector_store %arg6[%c0_31, %c0_32, %c0_33], %58 {strides = array<i32>} : memref<1x16x256xf32, #tpu.memory_space<vmem>>, vector<1x16x256xf32>,
    return
  }
  func.func @transform_0(%arg0: i32) -> (i32, i32, i32) {
    %c0_i32 = arith.constant 0 : i32
    %c0_i32_0 = arith.constant 0 : i32
    %c0_i32_1 = arith.constant 0 : i32
    return %arg0, %c0_i32, %c0_i32_0 : i32, i32, i32
  }
  func.func @transform_1(%arg0: i32) -> (i32, i32) {
    %c0_i32 = arith.constant 0 : i32
    %c0_i32_0 = arith.constant 0 : i32
    %c0_i32_1 = arith.constant 0 : i32
    return %c0_i32, %c0_i32_0 : i32, i32
  }
  func.func @transform_2(%arg0: i32) -> (i32, i32) {
    %c0_i32 = arith.constant 0 : i32
    %c0_i32_0 = arith.constant 0 : i32
    %c0_i32_1 = arith.constant 0 : i32
    return %c0_i32, %c0_i32_0 : i32, i32
  }
  func.func @transform_3(%arg0: i32) -> (i32, i32) {
    %c0_i32 = arith.constant 0 : i32
    %c0_i32_0 = arith.constant 0 : i32
    %c0_i32_1 = arith.constant 0 : i32
    return %c0_i32, %c0_i32_0 : i32, i32
  }
  func.func @transform_4(%arg0: i32) -> (i32, i32) {
    %c0_i32 = arith.constant 0 : i32
    %c0_i32_0 = arith.constant 0 : i32
    %c0_i32_1 = arith.constant 0 : i32
    return %c0_i32, %c0_i32_0 : i32, i32
  }
  func.func @transform_5(%arg0: i32) -> (i32, i32, i32) {
    %c0_i32 = arith.constant 0 : i32
    %c0_i32_0 = arith.constant 0 : i32
    %c0_i32_1 = arith.constant 0 : i32
    return %arg0, %c0_i32, %c0_i32_0 : i32, i32, i32
  }
}

</mosaic_0001>

<bundles_post_ra>
// kernel: spcn_block.1
= control target key start
LH: loop header
LB: loop body
LE: loop exit
PB: predicated region body
PF: predicated region fallthrough
CT: control target
= control target key end

     0   :  { %s689_s20 = smov 0   ;;  %s753_s0 = inlined_call_operand.vmem [shape: f32[2,4,256], index: 0, kind: input, shape index: {}]   ;;  %s754_s1 = inlined_call_operand.vmem [shape: bf16[16,36], index: 1, kind: input, shape index: {}]   ;;  %s755_s2 = inlined_call_operand.vmem [shape: f32[16,1], index: 2, kind: input, shape index: {}]   ;;  %s756_s3 = inlined_call_operand.vmem [shape: f32[9,256], index: 3, kind: input, shape index: {}]   ;;  %s757_s4 = inlined_call_operand.<no memory space> [shape: f32[1,1], index: 4, kind: input, shape index: {}]   ;;  %s758_s5 = inlined_call_operand.vmem [shape: f32[2,16,256], index: 5, kind: output, shape index: {}]  }
   0x1   :  { %10 = sst [smem:[#allocation3]] %s757_s4 }
   0x2 LB: > { %s592_s21 = sadd.s32 4294967295, %s645_s20   ;;  %p596_p0 = scmp.ge.s32.totalorder %s645_s20, 1  ;;  %s645_s20 = sphi %s689_s20, %s16_s20  }
   0x3   : > { %p188_p1 = scmp.lt.s32.totalorder %s645_s20, 3 }
   0x5   : > { %p189_p2 = pnand %p596_p0, %p188_p1 }
   0x6   : > { %p216_p3 = scmp.lt.s32.totalorder (!%p189_p2), %s592_s21, 1  ;;  %s647_s25 = smov (!%p189_p2), 16  }
   0x7   : > { %192 = sbr.rel (%p189_p2) target bundleno = 386 (0x182), region = 40  ;;  %s648_s26 = smov (!%p189_p2), 1  }
   0x8   : > { %s649_s27 = smov (!%p189_p2), 127   ;;  %s650_s28 = smov (!%p189_p2), 113  }
   0x9   : > { %s651_s29 = smov (!%p189_p2), 112   ;;  %s652_s30 = smov (!%p189_p2), 111  }
   0xa   : > { %s653_s6 = smov (!%p189_p2), 17   ;;  %s654_s7 = smov (!%p189_p2), 15  }
   0xc   : > { %s760_s21 = smov (!%p216_p3, %s592_s21), 1  ;;  %v238_v19 = vlaneseq  ;;  %v601_v22 = vld [vmem:[%s756_s3 + $0x1] ss:$8 sm:$0x3]  ;;  %vm484_vm7 = vcmask 1041408   ;;  %vm480_vm9 = vcmask 293888  }
   0xd   : > { %s616_s4 = sshll.u32 %s760_s21, 3  ;;  %v268_v24 = vperm.slane %v601_v22, 0  ;;  %v269_v25 = vperm.slane %v601_v22, 1  ;;  %v603_v32 = vld [vmem:[%s756_s3 + $0x3] ss:$8 sm:$0x3] }
   0xe   : > { %s220_s24 = scalar_lea.vmem %s753_s0, %s616_s4  ;;  %v703_v20 = vand.u32 127, %v238_v19  ;;  %v320_v33 = vperm.slane %v603_v32, 0  ;;  %v321_v34 = vperm.slane %v603_v32, 1  ;;  %v606_v44 = vld [vmem:[%s756_s3 + $0x7] ss:$8 sm:$0x3] }
   0xf   : > { %v227_v0 = vld [vmem:[%s220_s24] sm:$0xff]  ;;  %v408_v45 = vperm.slane %v606_v44, 0  ;;  %v409_v46 = vperm.slane %v606_v44, 1 }
  0x10   : > { %229 = vst [vmem:[#allocation1] ss:$2 sm:$0xff] %v227_v0  ;;  %vm262_vm0 = vcmp.lt.s32.totalorder %v703_v20, 16  ;;  %vm314_vm1 = vcmp.lt.s32.totalorder %v703_v20, 1  ;;  %vm402_vm2 = vcmp.lt.s32.totalorder %v703_v20, 112  ;;  %vm350_vm3 = vcmp.lt.s32.totalorder %v703_v20, 127 }
  0x11   : > { %v604_v53 = vld [vmem:[%s756_s3 + $0x5] ss:$8 sm:$0x3]  ;;  %v605_v63 = vld [vmem:[%s756_s3 + $0x6] ss:$8 sm:$0x3] }
  0x12   : > { %v356_v56 = vperm.slane %v604_v53, 0  ;;  %v357_v57 = vperm.slane %v604_v53, 1  ;;  %vm379_vm4 = vcmp.lt.s32.totalorder %v703_v20, 113  ;;  %vm431_vm5 = vcmp.lt.s32.totalorder %v703_v20, 111  ;;  %v463_v19 = vld [vmem:[%s755_s2] sm:$0xff] }
  0x13   : > { %v243_v22 = vld [vmem:[%s756_s3] ss:$8 sm:$0x3]  ;;  %vm240_vm6 = vcmp.lt.s32.totalorder %v703_v20, 17  ;;  %vm291_vm8 = vcmp.lt.s32.totalorder %v703_v20, 15 }
  0x17   : > { %v230_v1 = vld.sshfl [vmem:[#allocation1] sm:$0xff pattern:$0x75316420]  ;;  %v231_v2 = vld.sshfl [vmem:[#allocation1 + $0x8] sm:$0xff pattern:$0x75316420] }
  0x18   : > { %253 = vst [vmem:[#allocation1] ss:$2 sm:$0xff] %v227_v0 }
  0x1f   : > { %v254_v3 = vld.sshfl [vmem:[#allocation1] sm:$0xff pattern:$0x75316420]  ;;  %v255_v4 = vld.sshfl [vmem:[#allocation1 + $0x8] sm:$0xff pattern:$0x75316420] }
  0x20   : > { %282 = vst [vmem:[#allocation1] ss:$2 sm:$0xff] %v227_v0  ;;  %260 = vrot.lane.b32.xlu0 %v255_v4, %s647_s25  ;;  %258 = vrot.lane.b32.xlu2 %v254_v3, %s647_s25  ;;  %v386_v3 = vperm.slane %v605_v63, 1 }
  0x27   : > { %v283_v5 = vld.sshfl [vmem:[#allocation1] sm:$0xff pattern:$0x75316420]  ;;  %v284_v6 = vld.sshfl [vmem:[#allocation1 + $0x8] sm:$0xff pattern:$0x75316420] }
  0x28   : > { %305 = vst [vmem:[#allocation1] ss:$2 sm:$0xff] %v227_v0 }
  0x2f   : > { %v306_v7 = vld.sshfl [vmem:[#allocation1] sm:$0xff pattern:$0x75316420]  ;;  %v307_v8 = vld.sshfl [vmem:[#allocation1 + $0x8] sm:$0xff pattern:$0x75316420] }
  0x30   : > { %310 = vrot.lane.b32.xlu1 %v306_v7, %s648_s26  ;;  %334 = vst [vmem:[#allocation1] ss:$2 sm:$0xff] %v227_v0  ;;  %312 = vrot.lane.b32.xlu2 %v307_v8, %s648_s26 }
  0x37   : > { %v335_v9 = vld.sshfl [vmem:[#allocation1] sm:$0xff pattern:$0x75316420]  ;;  %v336_v10 = vld.sshfl [vmem:[#allocation1 + $0x8] sm:$0xff pattern:$0x75316420] }
  0x38   : > { %339 = vst [vmem:[#allocation2 + $0x48] sm:$0xf] %v335_v9 }
  0x39   : > { %340 = vst [vmem:[#allocation2 + $0x28] sm:$0xf] %v336_v10 }
  0x3a   : > { %341 = vst [vmem:[#allocation1] ss:$2 sm:$0xff] %v227_v0 }
  0x41   : > { %v342_v11 = vld.sshfl [vmem:[#allocation1] sm:$0xff pattern:$0x75316420]  ;;  %v343_v12 = vld.sshfl [vmem:[#allocation1 + $0x8] sm:$0xff pattern:$0x75316420] }
  0x42   : > { %346 = vrot.lane.b32.xlu1 %v342_v11, %s649_s27  ;;  %370 = vst [vmem:[#allocation1] ss:$2 sm:$0xff] %v227_v0  ;;  %v607_v11 = vld [vmem:[%s756_s3 + $0x10] ss:$8 sm:$0x3] }
  0x49   : > { %v372_v13 = vld.sshfl [vmem:[#allocation1 + $0x8] sm:$0xff pattern:$0x75316420]  ;;  %v371_v14 = vld.sshfl [vmem:[#allocation1] sm:$0xff pattern:$0x75316420] }
  0x4a   : > { %348 = vrot.lane.b32.xlu1 %v343_v12, %s649_s27  ;;  %375 = vrot.lane.b32.xlu0 %v371_v14, %s650_s28  ;;  %393 = vst [vmem:[#allocation1] ss:$2 sm:$0xff] %v227_v0  ;;  %v437_v12 = vperm.slane %v607_v11, 0 }
  0x51   : > { %v394_v15 = vld.sshfl [vmem:[#allocation1] sm:$0xff pattern:$0x75316420]  ;;  %v395_v16 = vld.sshfl [vmem:[#allocation1 + $0x8] sm:$0xff pattern:$0x75316420] }
  0x52   : > { %377 = vrot.lane.b32.xlu1 %v372_v13, %s650_s28  ;;  %422 = vst [vmem:[#allocation1] ss:$2 sm:$0xff] %v227_v0  ;;  %398 = vrot.lane.b32.xlu2 %v394_v15, %s651_s29  ;;  %v438_v13 = vperm.slane %v607_v11, 1 }
  0x59   : > { %v423_v17 = vld.sshfl [vmem:[#allocation1] sm:$0xff pattern:$0x75316420]  ;;  %v424_v18 = vld.sshfl [vmem:[#allocation1 + $0x8] sm:$0xff pattern:$0x75316420] }
  0x5a   : > { %427 = vrot.lane.b32.xlu0 %v423_v17, %s652_s30  ;;  %400 = vrot.lane.b32.xlu2 %v395_v16, %s651_s29 }
  0x5b   : > { %236 = vrot.lane.b32.xlu1 %v231_v2, %s653_s6  ;;  %v385_v2 = vperm.slane %v605_v63, 0 }
  0x62   : > { %429 = vrot.lane.b32.xlu0 %v424_v18, %s652_s30  ;;  %287 = vrot.lane.b32.xlu2 %v283_v5, %s654_s7 }
  0x6a   : > { %234 = vrot.lane.b32.xlu0 %v230_v1, %s653_s6  ;;  %s519_s6 = sld [smem:[#allocation3]] }
  0x72   : > { %289 = vrot.lane.b32.xlu0 %v284_v6, %s654_s7  ;;  %s617_s7 = sshll.u32 %s760_s21, 5 }
  0x73   : > { %s225_s10 = scalar_lea.vmem %s758_s5, %s617_s7 }
  0x7a   : > { %v259_v21 = vpop.permute.xlu2 %258 }
  0x8a   : > { %v313_v36 = vpop.permute.xlu2 %312 }
  0x92   : > { %v261_v23 = vpop.permute.xlu0 %260 }
  0x93   : > { %v263_v26 = vsel %vm262_vm0, %v259_v21, %v261_v23  ;;  %v264_v27 = vsel %vm262_vm0, %v261_v23, %v259_v21  ;;  %v464_v21 = vld [vmem:[%s755_s2 + $0x8] sm:$0xff]  ;;  %v655_v23 = vmov 0  }
  0x94   : > { %v272_v28 = vmul.f32 %v268_v24, %v264_v27  ;;  %v273_v29 = vmul.f32 %v269_v25, %v263_v26  ;;  %636 = vset.pattern.permute.xlu1 %v655_v23  ;;  %637 = vset.pattern.permute.xlu2 %v655_v23  ;;  %v245_v25 = vperm.slane %v243_v22, 0  ;;  %v246_v26 = vperm.slane %v243_v22, 1 }
  0x95   : > { %467 = vperm.xlu1 %636, %v463_v19   ;;  %472 = vperm.xlu2 %637, %v464_v21  }
  0x96   : > { %v276_v30 = vrot.slane %v272_v28, 4  ;;  %v277_v31 = vrot.slane %v273_v29, 4  ;;  %638 = vset.pattern.permute.xlu0 %v655_v23 }
  0x98   : > { %280 = vst [vmem:[#allocation2 + $0x30] sm:$0xf0] %v276_v30 }
  0x99   : > { %281 = vst [vmem:[#allocation2] sm:$0xf0] %v277_v31 }
  0xa2   : > { %v311_v35 = vpop.permute.xlu1 %310 }
  0xa3   : > { %v315_v37 = vsel %vm314_vm1, %v311_v35, %v313_v36  ;;  %v316_v38 = vsel %vm314_vm1, %v313_v36, %v311_v35 }
  0xa4   : > { %v324_v39 = vmul.f32 %v320_v33, %v316_v38  ;;  %v325_v40 = vmul.f32 %v321_v34, %v315_v37  ;;  %v602_v33 = vld [vmem:[%s756_s3 + $0x2] ss:$8 sm:$0x3] }
  0xa6   : > { %v328_v41 = vrot.slane %v324_v39, 4  ;;  %v329_v42 = vrot.slane %v325_v40, 4  ;;  %v297_v39 = vperm.slane %v602_v33, 0  ;;  %v298_v40 = vperm.slane %v602_v33, 1 }
  0xa8   : > { %332 = vst [vmem:[#allocation2 + $0x18] sm:$0xf0] %v328_v41 }
  0xa9   : > { %333 = vst [vmem:[#allocation2 + $0x10] sm:$0xf0] %v329_v42 }
  0xac   : > { %v399_v43 = vpop.permute.xlu2 %398 }
  0xb4   : > { %v347_v47 = vpop.permute.xlu1 %346  ;;  %v401_v48 = vpop.permute.xlu2 %400 }
  0xb5   : > { %v403_v49 = vsel %vm402_vm2, %v399_v43, %v401_v48  ;;  %v404_v50 = vsel %vm402_vm2, %v401_v48, %v399_v43 }
  0xb6   : > { %v412_v51 = vmul.f32 %v408_v45, %v403_v49  ;;  %v413_v52 = vmul.f32 %v409_v46, %v404_v50 }
  0xb8   : > { %v416_v54 = vrot.slane %v412_v51, 4  ;;  %v417_v55 = vrot.slane %v413_v52, 4 }
  0xba   : > { %420 = vst [vmem:[#allocation2 + $0x8] sm:$0xf0] %v416_v54 }
  0xbb   : > { %421 = vst [vmem:[#allocation2 + $0x20] sm:$0xf0] %v417_v55 }
  0xbc   : > { %v349_v58 = vpop.permute.xlu1 %348  ;;  %v376_v4 = vpop.permute.xlu0 %375 }
  0xbd   : > { %v351_v59 = vsel %vm350_vm3, %v347_v47, %v349_v58  ;;  %v352_v60 = vsel %vm350_vm3, %v349_v58, %v347_v47  ;;  %v288_v38 = vpop.permute.xlu2 %287  ;;  %v618_v58 = vld [vmem:[%s754_s1] sm:$0xff] }
  0xbe   : > { %v360_v61 = vmul.f32 %v356_v56, %v351_v59  ;;  %v361_v62 = vmul.f32 %v357_v57, %v352_v60 }
  0xc0   : > { %v364_v0 = vrot.slane %v360_v61, 4  ;;  %v365_v1 = vrot.slane %v361_v62, 4  ;;  %v524_v61 = vstv %s519_s6 }
  0xc2   : > { %368 = vst [vmem:[#allocation2 + $0x48] sm:$0xf0] %v364_v0 }
  0xc3   : > { %369 = vst [vmem:[#allocation2 + $0x28] sm:$0xf0] %v365_v1 }
  0xc4   : > { %v378_v5 = vpop.permute.xlu1 %377 }
  0xc5   : > { %v380_v6 = vsel %vm379_vm4, %v376_v4, %v378_v5  ;;  %v381_v7 = vsel %vm379_vm4, %v378_v5, %v376_v4 }
  0xc6   : > { %v389_v8 = vmul.f32 %v385_v2, %v380_v6  ;;  %v390_v9 = vmul.f32 %v386_v3, %v381_v7 }
  0xc8   : > { %391 = vst [vmem:[#allocation2 + $0x8] sm:$0xf] %v389_v8 }
  0xc9   : > { %392 = vst [vmem:[#allocation2 + $0x20] sm:$0xf] %v390_v9  ;;  %v451_v41 = vld [vmem:[#allocation2 + $0x48] sm:$0xff] }
  0xca   : > { %v452_v44 = vld [vmem:[#allocation2 + $0x28] sm:$0xff] }
  0xcc   : > { %v428_v10 = vpop.permute.xlu0 %427 }
  0xcd   : > { %v237_v24 = vpop.permute.xlu1 %236 }
  0xcf   : > { %v453_v42 = vld [vmem:[#allocation2 + $0x8] sm:$0xff] }
  0xd0   : > { %v454_v45 = vld [vmem:[#allocation2 + $0x20] sm:$0xff]  ;;  %v459_v49 = vpack.c.bf16 %v453_v42, %v451_v41 }
  0xd1   : > { %v460_v52 = vpack.c.bf16 %v454_v45, %v452_v44 }
  0xd4   : > { %v430_v14 = vpop.permute.xlu0 %429 }
  0xd5   : > { %v432_v15 = vsel %vm431_vm5, %v428_v10, %v430_v14  ;;  %v433_v16 = vsel %vm431_vm5, %v430_v14, %v428_v10 }
  0xd6   : > { %v441_v17 = vmul.f32 %v437_v12, %v432_v15  ;;  %v442_v18 = vmul.f32 %v438_v13, %v433_v16 }
  0xd8   : > { %443 = vst [vmem:[#allocation2 + $0x40] sm:$0xf] %v441_v17 }
  0xd9   : > { %444 = vst [vmem:[#allocation2 + $0x38] sm:$0xf] %v442_v18 }
  0xdc   : > { %v235_v27 = vpop.permute.xlu0 %234 }
  0xdd   : > { %v241_v28 = vsel %vm240_vm6, %v235_v27, %v237_v24  ;;  %v242_v29 = vsel %vm240_vm6, %v237_v24, %v235_v27 }
  0xde   : > { %v249_v30 = vmul.f32 %v245_v25, %v242_v29  ;;  %v250_v31 = vmul.f32 %v246_v26, %v241_v28 }
  0xdf   : > { %v455_v32 = vld [vmem:[#allocation2 + $0x40] sm:$0xf] }
  0xe0   : > { %251 = vst [vmem:[#allocation2 + $0x30] sm:$0xf] %v249_v30  ;;  %v461_v34 = vpack.c.bf16 %v455_v32, %v455_v32  ;;  %v456_v35 = vld [vmem:[#allocation2 + $0x38] sm:$0xf] }
  0xe1   : > { %252 = vst [vmem:[#allocation2] sm:$0xf] %v250_v31  ;;  %v462_v36 = vpack.c.bf16 %v456_v35, %v456_v35 }
  0xe2   : > { %v486_v37 = vsel %vm484_vm7, %v461_v34, 0 }
  0xe3   : > { %496 = vmatpush.bf16.msra.mxu0 %v486_v37  ;;  %v489_v43 = vsel %vm484_vm7, %v462_v36, 0 }
  0xe4   : > { %510 = vmatpush.bf16.msra.mxu1 %v489_v43  ;;  %v290_v46 = vpop.permute.xlu0 %289 }
  0xe5   : > { %v292_v47 = vsel %vm291_vm8, %v288_v38, %v290_v46  ;;  %v293_v48 = vsel %vm291_vm8, %v290_v46, %v288_v38 }
  0xe6   : > { %v301_v50 = vmul.f32 %v297_v39, %v293_v48  ;;  %v302_v51 = vmul.f32 %v298_v40, %v292_v47 }
  0xe7   : > { %497 = vmatpush.bf16.msra.mxu0 %v459_v49  ;;  %v447_v20 = vld [vmem:[#allocation2 + $0x30] sm:$0xff] }
  0xe8   : > { %303 = vst [vmem:[#allocation2 + $0x18] sm:$0xf] %v301_v50  ;;  %511 = vmatpush.bf16.msra.mxu1 %v460_v52  ;;  %v448_v55 = vld [vmem:[#allocation2] sm:$0xff] }
  0xe9   : > { %304 = vst [vmem:[#allocation2 + $0x10] sm:$0xf] %v302_v51 }
  0xef   : > { %v449_v53 = vld [vmem:[#allocation2 + $0x18] sm:$0xff]  ;;  %v473_v5 = vpop.permute.xlu2 %472 }
  0xf0   : > { %v457_v54 = vpack.c.bf16 %v449_v53, %v447_v20  ;;  %v450_v56 = vld [vmem:[#allocation2 + $0x10] sm:$0xff] }
  0xf1   : > { %v458_v57 = vpack.c.bf16 %v450_v56, %v448_v55 }
  0xf2   : > { %498 = vmatpush.bf16.msra.mxu0 %v457_v54 }
  0xf3   : > { %512 = vmatpush.bf16.msra.mxu1 %v458_v57 }
  0xf5   : > { %612 = vmatmul.msk.bf16.vlgmr.msra.gmra.mxu0 %vm480_vm9, %v618_v58 }
  0xf6   : > { %613 = vmatmul.msk.bf16.vlgmr.msra.gmra.mxu1 %vm480_vm9, %v618_v58 }
 0x107   : > { %v468_v59 = vpop.permute.xlu1 %467 }
 0x172   : > { %v500_v60 = vpop.f32.mrf.mxu0 }
 0x173   : > { %v501_v62 = vadd.f32 %v500_v60, %v468_v59  ;;  %v514_v63 = vpop.f32.mrf.mxu1 }
 0x174   : > { %v515_v0 = vadd.f32 %v514_v63, %v468_v59 }
 0x175   : > { %vm520_vm10 = vcmp.gt.f32.partialorder %v501_v62, 0.0  ;;  %v525_v1 = vmul.f32 %v524_v61, %v501_v62 }
 0x176   : > { %vm521_vm11 = vcmp.gt.f32.partialorder %v515_v0, 0.0  ;;  %v526_v2 = vmul.f32 %v524_v61, %v515_v0 }
 0x177   : > { %v529_v3 = vsel %vm520_vm10, %v501_v62, %v525_v1 }
 0x178   : > { %533 = vst [vmem:[%s225_s10] sm:$0xff] %v529_v3  ;;  %v530_v4 = vsel %vm521_vm11, %v515_v0, %v526_v2 }
 0x179   : > { %534 = vst [vmem:[%s225_s10 + $0x8] sm:$0xff] %v530_v4 }
 0x17a   : > { %v502_v6 = vpop.f32.mrf.mxu0 }
 0x17b   : > { %v503_v7 = vadd.f32 %v502_v6, %v473_v5  ;;  %v516_v8 = vpop.f32.mrf.mxu1 }
 0x17c   : > { %v517_v9 = vadd.f32 %v516_v8, %v473_v5 }
 0x17d   : > { %vm522_vm12 = vcmp.gt.f32.partialorder %v503_v7, 0.0  ;;  %v527_v10 = vmul.f32 %v524_v61, %v503_v7 }
 0x17e   : > { %vm523_vm13 = vcmp.gt.f32.partialorder %v517_v9, 0.0  ;;  %v528_v11 = vmul.f32 %v524_v61, %v517_v9 }
 0x17f   : > { %v531_v12 = vsel %vm522_vm12, %v503_v7, %v527_v10 }
 0x180   : > { %535 = vst [vmem:[%s225_s10 + $0x10] sm:$0xff] %v531_v12  ;;  %v532_v13 = vsel %vm523_vm13, %v517_v9, %v528_v11 }
 0x181   : > { %536 = vst [vmem:[%s225_s10 + $0x18] sm:$0xff] %v532_v13 }
 0x182 PF: > { %s16_s20 = sadd.s32 1, %s645_s20  }
 0x183   : > { %p13_p4 = scmp.ge.s32.totalorder %s16_s20, 4  }
 0x185   :  { %15 = sbr.rel (!%p13_p4) target bundleno = 2 (0x2), region = 77 }

</bundles_post_ra>
